<compile_context>
chip_gen: v7x
topology: tpu7x:2x2x1
jax: 0.10.0
libtpu: 0.0.40
codegen_flags: <defaults>
</compile_context>

<pallas_src>
import jax
import jax.numpy as jnp
from jax.experimental import pallas as pl
from jax.experimental.pallas import tpu as pltpu


def _scaling_kernel(shift_ref, inv_scale_ref, x_ref, o_ref):
    # shift_ref / inv_scale_ref: VMEM (TR, 1) f32 — broadcast over the lane dim.
    # x_ref / o_ref:             VMEM (TR, TC) in the activation dtype.
    x = x_ref[...].astype(jnp.float32)
    o_ref[...] = ((x - shift_ref[...]) * inv_scale_ref[...]).astype(o_ref.dtype)


def _tpu_budget():
    """Returns (target_block_bytes, vmem_limit_bytes, min_parallel_blocks)."""
    try:
        info = pltpu.get_tpu_info()
        vmem_cap = getattr(info, "vmem_capacity_bytes", None)
    except Exception:
        vmem_cap = None
    if vmem_cap is None:
        # Unknown chip: stay under every generation's default scoped VMEM.
        return 2 * 1024 * 1024, None, 1
    if vmem_cap <= 96 * 1024 * 1024:
        # v7x-like: 64 MiB VMEM per TC, ~3.2 TB/s HBM, 2 TensorCores.
        return 6 * 1024 * 1024, 48 * 1024 * 1024, 2
    # v5e / v6e: 128 MiB physical VMEM (raise above v5e's 16 MiB scoped default).
    return 4 * 1024 * 1024, 32 * 1024 * 1024, 1


def _pick_lane_tile(hw, max_elems):
    """Largest lane tile <= max_elems: full hw if it fits, else a
    multiple-of-128 divisor of hw (no ragged tail), else a multiple of 128."""
    if hw <= max_elems:
        return hw
    limit = max(128, (max_elems // 128) * 128)
    t = limit
    while t >= 128:
        if hw % t == 0:
            return t
        t -= 128
    return limit


def scaling_layer(x, shift, scale):
    """(x - shift[None,:,None,None]) / scale[None,:,None,None] for NCHW x."""
    N, C, H, W = x.shape
    rows, hw = N * C, H * W
    itemsize = jnp.dtype(x.dtype).itemsize

    target_block_bytes, vmem_limit_bytes, min_blocks = _tpu_budget()
    max_elems = max(128, target_block_bytes // itemsize)

    # Lane tile first: grow toward the full H*W row under the byte budget.
    tc = _pick_lane_tile(hw, max_elems)

    # Then rows: as many as fit the remaining budget (multiple of 8, or all).
    row_budget = max(1, max_elems // tc)
    if rows <= row_budget:
        tr = rows
    else:
        tr = max(8, (row_budget // 8) * 8)

    # On 2-TC chips make sure at least one "parallel" axis has >= 2 blocks.
    if min_blocks > 1 and pl.cdiv(rows, tr) * pl.cdiv(hw, tc) < min_blocks:
        if rows > 8:
            tr = max(8, ((rows // min_blocks) // 8) * 8)
        elif hw >= 256:
            tc = _pick_lane_tile(hw, max(128, hw // min_blocks))

    grid = (pl.cdiv(rows, tr), pl.cdiv(hw, tc))

    # Lane-dense 2-D view: one row per (image, channel) plane.
    x2 = x.reshape(rows, hw)

    # Per-row parameters in f32; exact f32 reciprocal so results stay within
    # a couple ULP of the true divide.
    shift_f32 = jnp.ravel(shift).astype(jnp.float32)
    inv_scale_f32 = 1.0 / jnp.ravel(scale).astype(jnp.float32)
    shift_rows = jnp.tile(shift_f32, N).reshape(rows, 1)        # row r -> channel r % C
    inv_scale_rows = jnp.tile(inv_scale_f32, N).reshape(rows, 1)

    out2 = pl.pallas_call(
        _scaling_kernel,
        out_shape=jax.ShapeDtypeStruct((rows, hw), x.dtype),
        grid=grid,
        in_specs=[
            pl.BlockSpec((tr, 1), lambda i, j: (i, 0)),    # shift     (rows, 1)
            pl.BlockSpec((tr, 1), lambda i, j: (i, 0)),    # 1 / scale (rows, 1)
            pl.BlockSpec((tr, tc), lambda i, j: (i, j)),   # x         (rows, hw)
        ],
        out_specs=pl.BlockSpec((tr, tc), lambda i, j: (i, j)),
        compiler_params=pltpu.CompilerParams(
            dimension_semantics=("parallel", "parallel"),
            vmem_limit_bytes=vmem_limit_bytes,
        ),
        cost_estimate=pl.CostEstimate(
            flops=2 * rows * hw,
            bytes_accessed=2 * rows * hw * itemsize,
            transcendentals=0,
        ),
    )(shift_rows, inv_scale_rows, x2)

    return out2.reshape(N, C, H, W)


if __name__ == "__main__":
    # Buffers from the module's __init__ (C is fixed at 3 by the module).
    shift = jnp.array([-0.030, -0.088, -0.188], dtype=jnp.float32)
    scale = jnp.array([0.458, 0.448, 0.450], dtype=jnp.float32)

    key = jax.random.PRNGKey(0)
    k1, k2 = jax.random.split(key)

    # Small deterministic f32 input: batch=2, channels=3, 16x16 spatial.
    x = jax.random.normal(k1, (2, 3, 16, 16), dtype=jnp.float32)
    out = jax.block_until_ready(scaling_layer(x, shift, scale))
    ref = (x - shift[None, :, None, None]) / scale[None, :, None, None]
    assert out.shape == x.shape and out.dtype == x.dtype
    assert jnp.allclose(out, ref, atol=1e-6, rtol=1e-6)

    # bf16 case exercising the dtype-aware block budget.
    xb = jax.random.normal(k2, (2, 3, 32, 32), dtype=jnp.float32).astype(jnp.bfloat16)
    outb = jax.block_until_ready(scaling_layer(xb, shift, scale))
    refb = ((xb.astype(jnp.float32) - shift[None, :, None, None])
            / scale[None, :, None, None]).astype(jnp.bfloat16)
    assert outb.shape == xb.shape and outb.dtype == xb.dtype
    assert jnp.allclose(outb.astype(jnp.float32), refb.astype(jnp.float32),
                        atol=2e-2, rtol=2e-2)

    print("KERNEL_OK")
</pallas_src>

<mosaic_0001>
module attributes {stable_mosaic.version = 11 : i64} {
  func.func @_scaling_kernel(%arg0: i32, %arg1: i32, %arg2: memref<6x1xf32, #tpu.memory_space<vmem>>, %arg3: memref<6x1xf32, #tpu.memory_space<vmem>>, %arg4: memref<6x256xf32, #tpu.memory_space<vmem>>, %arg5: memref<6x256xf32, #tpu.memory_space<vmem>>) attributes {dimension_semantics = [#tpu.dimension_semantics<parallel>, #tpu.dimension_semantics<parallel>], iteration_bounds = array<i64: 1, 1>, scalar_prefetch = 0 : i64, scratch_operands = 0 : i64, tpu.core_type = #tpu.core_type<tc>, window_params = [{transform_indices = @transform_0, window_bounds = array<i64: 6, 1>}, {transform_indices = @transform_1, window_bounds = array<i64: 6, 1>}, {transform_indices = @transform_2, window_bounds = array<i64: 6, 256>}, {transform_indices = @transform_3, window_bounds = array<i64: 6, 256>}]} {
    %c0 = arith.constant 0 : index
    %c0_0 = arith.constant 0 : index
    %0 = vector.load %arg4[%c0, %c0_0] : memref<6x256xf32, #tpu.memory_space<vmem>>, vector<6x256xf32>
    %c0_1 = arith.constant 0 : index
    %c0_2 = arith.constant 0 : index
    %1 = vector.load %arg2[%c0_1, %c0_2] : memref<6x1xf32, #tpu.memory_space<vmem>>, vector<6x1xf32>
    %2 = vector.broadcast %1 : vector<6x1xf32> to vector<6x256xf32>
    %3 = arith.subf %0, %2 : vector<6x256xf32>
    %c0_3 = arith.constant 0 : index
    %c0_4 = arith.constant 0 : index
    %4 = vector.load %arg3[%c0_3, %c0_4] : memref<6x1xf32, #tpu.memory_space<vmem>>, vector<6x1xf32>
    %5 = vector.broadcast %4 : vector<6x1xf32> to vector<6x256xf32>
    %6 = arith.mulf %3, %5 : vector<6x256xf32>
    %c0_5 = arith.constant 0 : index
    %c0_6 = arith.constant 0 : index
    %7 = vector.load %arg5[%c0_5, %c0_6] : memref<6x256xf32, #tpu.memory_space<vmem>>, vector<6x256xf32>
    tpu.vector_store %arg5[%c0_5, %c0_6], %6 {strides = array<i32>} : memref<6x256xf32, #tpu.memory_space<vmem>>, vector<6x256xf32>,
    return
  }
  func.func @transform_0(%arg0: i32, %arg1: i32) -> (i32, i32) {
    %c0_i32 = arith.constant 0 : i32
    %c0_i32_0 = arith.constant 0 : i32
    return %arg0, %c0_i32 : i32, i32
  }
  func.func @transform_1(%arg0: i32, %arg1: i32) -> (i32, i32) {
    %c0_i32 = arith.constant 0 : i32
    %c0_i32_0 = arith.constant 0 : i32
    return %arg0, %c0_i32 : i32, i32
  }
  func.func @transform_2(%arg0: i32, %arg1: i32) -> (i32, i32) {
    %c0_i32 = arith.constant 0 : i32
    return %arg0, %arg1 : i32, i32
  }
  func.func @transform_3(%arg0: i32, %arg1: i32) -> (i32, i32) {
    %c0_i32 = arith.constant 0 : i32
    return %arg0, %arg1 : i32, i32
  }
}

</mosaic_0001>

<bundles_post_ra>
// kernel: tpu_custom_call.1
= control target key start
LH: loop header
LB: loop body
LE: loop exit
PB: predicated region body
PF: predicated region fallthrough
CT: control target
= control target key end

     0   :  { %v76_v1 = vmov 0   ;;  %s122_s0 = inlined_call_operand.vmem [shape: f32[6,1], index: 0, kind: input, shape index: {}]   ;;  %s123_s1 = inlined_call_operand.vmem [shape: f32[6,1], index: 1, kind: input, shape index: {}]   ;;  %s124_s2 = inlined_call_operand.vmem [shape: f32[6,256], index: 2, kind: input, shape index: {}]   ;;  %s125_s3 = inlined_call_operand.hbm [shape: f32[6,256], index: 3, kind: output, shape index: {}]  }
   0x1   :  { %v17_v0 = vld [vmem:[%s122_s0] sm:$0x3f]  ;;  %51 = vset.pattern.permute.xlu0 %v76_v1 }
   0x2   :  { %8 = vsyncpa [#allocation3], 0  ;;  %20 = vperm.xlu0 %51, %v17_v0   ;;  %v25_v2 = vld [vmem:[%s123_s1] sm:$0x3f]  ;;  %v16_v5 = vld [vmem:[%s124_s2 + $0x8] sm:$0x3f] }
   0x3   :  { %v15_v4 = vld [vmem:[%s124_s2] sm:$0x3f]  ;;  %s77_s20 = smov [#allocation2]  }
   0x4   :  { %s41_s0 = sshll.u32 %s77_s20, 4  ;;  %s42_s0 = int_to_ptr.vmem [resolvable:$true] %s41_s0 }
   0x5   :  { %s52_s1 = scalar_lea.vmem %s42_s0, 256  ;;  %p57_p1 = scmp.lt.s32.totalorder %s42_s0, %s42_s0 }
   0x6   :  { %28 = vperm.xlu0 %51, %v25_v2   ;;  %p53_p0 = scmp.ne.s32.totalorder %s42_s0, %s52_s1  ;;  %p58_p2 = scmp.lt.s32.totalorder %s52_s1, %s52_s1 }
   0x8   :  { %p59_p3 = por %p58_p2, %p57_p1 }
   0xa   :  { %p60_p4 = pnand %p59_p3, %p53_p0 }
  0x81   :  { %v21_v3 = vpop.permute.xlu0 %20 }
  0x82   :  { %v23_v6 = vsub.f32 %v15_v4, %v21_v3  ;;  %v24_v7 = vsub.f32 %v16_v5, %v21_v3 }
  0x85   :  { %v29_v8 = vpop.permute.xlu0 %28 }
  0x86   :  { %v31_v9 = vmul.f32 %v29_v8, %v23_v6  ;;  %v32_v10 = vmul.f32 %v29_v8, %v24_v7 }
  0x88   :  { %33 = vst [vmem:[#allocation2] sm:$0x3f] %v31_v9  ;;  %34 = vst [vmem:[#allocation2 + $0x8] sm:$0x3f] %v32_v10 }
  0x89   :  { %63 = shalt.err (!%p60_p4)
}
  0x8a   :  { %s64_s2 = scalar_lea.hbm %s125_s3, 256 }
  0x8b   :  { %p65_p5 = scmp.ne.s32.totalorder %s125_s3, %s64_s2  ;;  %p68_p6 = scmp.lt.u32.totalorder %s64_s2, %s125_s3 }
  0x8d   :  { %p70_p7 = pnand %p68_p6, %p65_p5 }
  0x8f   :  { %73 = shalt.err (!%p70_p7)
}
  0x90   :  { %44 = dma.vmem_to_hbm [thread:$0]  %s42_s0, 256, %s125_s3, [#allocation3]  }
  0x91   :  { %74 = dma.done.wait [#allocation3], 256  }
  0x92   :  { %75 = vsyncadd [#allocation3], 4294967040 }
  0x93   :  { %48 = vsyncpa [#allocation3], 1 }

</bundles_post_ra>
